<compile_context>
chip_gen: v7x
topology: tpu7x:2x2x1
jax: 0.10.0
libtpu: 0.0.40
codegen_flags: <defaults>
</compile_context>

<pallas_src>
import functools

import numpy as np
import jax
import jax.numpy as jnp
from jax.experimental import pallas as pl
from jax.experimental.pallas import tpu as pltpu


# ----------------------------------------------------------------------------
# Host-built, cached interpolation matrices (never per-call scatter work).
# ----------------------------------------------------------------------------
@functools.lru_cache(maxsize=None)
def _interp_matrix_np(out_size: int, in_size: int) -> np.ndarray:
    """Row-stochastic bilinear (align_corners=True) matrix, shape (out, in)."""
    if out_size == 1:
        src = np.zeros((1,), np.float64)
    else:
        src = np.arange(out_size, dtype=np.float64) * ((in_size - 1) / (out_size - 1))
    i0 = np.clip(np.floor(src).astype(np.int64), 0, in_size - 1)
    i1 = np.clip(i0 + 1, 0, in_size - 1)
    frac = (src - i0).astype(np.float32)
    w = np.zeros((out_size, in_size), np.float32)
    rows = np.arange(out_size)
    np.add.at(w, (rows, i0), 1.0 - frac)
    np.add.at(w, (rows, i1), frac)
    return w


@functools.lru_cache(maxsize=None)
def _kron_interp_matrix_np(out_size: int, in_h: int, in_w: int) -> np.ndarray:
    """Fused bilinear weight kron(Wh, Ww)^T, shape (H*W, out*out), float32."""
    wh = _interp_matrix_np(out_size, in_h)        # (s, H)
    ww = _interp_matrix_np(out_size, in_w)        # (s, W)
    k = np.kron(wh, ww)                           # (s*s, H*W)
    return np.ascontiguousarray(k.T.astype(np.float32))  # (H*W, s*s)


# ----------------------------------------------------------------------------
# Kernels
# ----------------------------------------------------------------------------
def _make_kron_kernel(n_scales: int):
    """One block of `ct` flattened planes, one matmul per scale (fused H+W)."""

    def kernel(*refs):
        x_ref = refs[0]                         # (ct, H*W)
        w_refs = refs[1:1 + n_scales]           # (H*W, s*s) f32
        out_refs = refs[1 + n_scales:]          # (ct, s*s)

        x = x_ref[...].astype(jnp.float32)      # (ct, H*W), K = H*W
        for si in range(n_scales):
            y = jnp.dot(x, w_refs[si][...], preferred_element_type=jnp.float32)
            out_refs[si][...] = y.astype(out_refs[si].dtype)   # one lane-dense store

    return kernel


def _make_separable_kernel(n_scales: int, ct: int):
    """Fallback for large images: per-plane separable interp (K = W then H)."""

    def kernel(*refs):
        x_ref = refs[0]                                   # (ct, H, W)
        wh_refs = refs[1:1 + n_scales]                    # (s, H) f32
        wwt_refs = refs[1 + n_scales:1 + 2 * n_scales]    # (W, s) f32 (pre-transposed)
        out_refs = refs[1 + 2 * n_scales:]                # (ct, s, s)

        x = x_ref[...].astype(jnp.float32)
        for si in range(n_scales):
            wh = wh_refs[si][...]
            wwt = wwt_refs[si][...]
            for c in range(ct):                           # static unroll
                y = jnp.dot(x[c], wwt, preferred_element_type=jnp.float32)   # (H, s)
                z = jnp.dot(wh, y, preferred_element_type=jnp.float32)       # (s, s)
                out_refs[si][c] = z.astype(out_refs[si].dtype)

    return kernel


# ----------------------------------------------------------------------------
# Block sizing
# ----------------------------------------------------------------------------
def _vmem_budgets():
    """Generation-aware (plane-block budget, vmem_limit_bytes, prefer>=2 steps)."""
    try:
        cap = int(pltpu.get_tpu_info().vmem_capacity_bytes)
    except Exception:
        cap = 128 * 1024 * 1024
    if cap <= 64 * 1024 * 1024:
        # v7x-class: 64 MiB VMEM, 2 TensorCores -> smaller blocks, >=2 grid steps.
        return 14 * 1024 * 1024, 48 * 1024 * 1024, True
    # v5e / v6e: 128 MiB VMEM, single TC -> biggest block that fits wins.
    return 40 * 1024 * 1024, 96 * 1024 * 1024, False


def _choose_planes_per_step(nc, per_plane_bytes, weight_bytes, budget,
                            prefer_multi_step):
    """Sublane-aligned (multiple of 8) plane-block size fitting the budget."""
    nc8 = ((nc + 7) // 8) * 8
    fit = ((budget - weight_bytes) // max(per_plane_bytes, 1)) // 8 * 8
    ct = min(nc8, max(8, fit))
    if prefer_multi_step and ct >= nc8 and nc8 >= 16:
        ct = ((nc8 // 2 + 7) // 8) * 8        # give both TensorCores work (v7x)
    return max(8, ct)


# ----------------------------------------------------------------------------
# Wrapper: all scales in a single pallas_call (input read from HBM once).
# ----------------------------------------------------------------------------
@functools.partial(jax.jit, static_argnames=("sizes",))
def multi_scale_bilinear_pallas(x, sizes):
    """[F.interpolate(x, (s, s), 'bilinear', align_corners=True) for s in sizes]."""
    if not jnp.issubdtype(x.dtype, jnp.floating):
        x = x.astype(jnp.float32)
    n, c, h, w = x.shape
    nc = n * c
    n_scales = len(sizes)
    itemsize = jnp.dtype(x.dtype).itemsize

    budget, vmem_limit, prefer_multi = _vmem_budgets()

    kron_weight_bytes = 4 * sum(h * w * s * s for s in sizes)
    use_kron = (h * w <= 4096) and (kron_weight_bytes <= 8 * 1024 * 1024)

    if use_kron:
        weights = [jnp.asarray(_kron_interp_matrix_np(s, h, w)) for s in sizes]
        # Live bytes per plane: input block (x2 double buffer) + its f32 copy
        # + per-scale output blocks (x2) + f32 pre-cast results.
        per_plane_bytes = (h * w * (2 * itemsize + 4)
                           + sum(s * s for s in sizes) * (2 * itemsize + 4))
        ct = _choose_planes_per_step(nc, per_plane_bytes, 2 * kron_weight_bytes,
                                     budget, prefer_multi)
        padded_nc = ((nc + ct - 1) // ct) * ct
        x2 = x.reshape(nc, h * w)
        if padded_nc != nc:
            x2 = jnp.pad(x2, ((0, padded_nc - nc), (0, 0)))
        grid = (padded_nc // ct,)

        in_specs = ([pl.BlockSpec((ct, h * w), lambda i: (i, 0))]
                    + [pl.BlockSpec((h * w, s * s), lambda i: (0, 0)) for s in sizes])
        out_specs = tuple(pl.BlockSpec((ct, s * s), lambda i: (i, 0)) for s in sizes)
        out_shape = tuple(jax.ShapeDtypeStruct((padded_nc, s * s), x.dtype)
                          for s in sizes)
        kernel = _make_kron_kernel(n_scales)
        args = (x2, *weights)

        flops = sum(2 * padded_nc * h * w * s * s for s in sizes)
        bytes_accessed = (padded_nc * h * w * itemsize + kron_weight_bytes
                          + itemsize * sum(padded_nc * s * s for s in sizes))
        lane_dense = True
    else:
        # Separable fallback for large images (Kron weights would not fit VMEM).
        wh_list = [jnp.asarray(_interp_matrix_np(s, h)) for s in sizes]
        wwt_list = [jnp.asarray(np.ascontiguousarray(_interp_matrix_np(s, w).T))
                    for s in sizes]
        weight_bytes = 2 * 4 * sum(s * h + w * s for s in sizes)
        per_plane_bytes = (h * w * (2 * itemsize + 4)
                           + 4 * sum(h * s for s in sizes)
                           + sum(s * s for s in sizes) * (2 * itemsize + 4))
        ct = _choose_planes_per_step(nc, per_plane_bytes, weight_bytes,
                                     budget, prefer_multi)
        padded_nc = ((nc + ct - 1) // ct) * ct
        x2 = x.reshape(nc, h, w)
        if padded_nc != nc:
            x2 = jnp.pad(x2, ((0, padded_nc - nc), (0, 0), (0, 0)))
        grid = (padded_nc // ct,)

        in_specs = ([pl.BlockSpec((ct, h, w), lambda i: (i, 0, 0))]
                    + [pl.BlockSpec((s, h), lambda i: (0, 0)) for s in sizes]
                    + [pl.BlockSpec((w, s), lambda i: (0, 0)) for s in sizes])
        out_specs = tuple(pl.BlockSpec((ct, s, s), lambda i: (i, 0, 0))
                          for s in sizes)
        out_shape = tuple(jax.ShapeDtypeStruct((padded_nc, s, s), x.dtype)
                          for s in sizes)
        kernel = _make_separable_kernel(n_scales, ct)
        args = (x2, *wh_list, *wwt_list)

        flops = sum(2 * padded_nc * h * w * s + 2 * padded_nc * h * s * s
                    for s in sizes)
        bytes_accessed = (padded_nc * h * w * itemsize
                          + 4 * sum(s * h + w * s for s in sizes)
                          + itemsize * sum(padded_nc * s * s for s in sizes))
        lane_dense = False

    outs = pl.pallas_call(
        kernel,
        grid=grid,
        in_specs=in_specs,
        out_specs=out_specs,
        out_shape=out_shape,
        compiler_params=pltpu.CompilerParams(
            dimension_semantics=("parallel",),
            vmem_limit_bytes=vmem_limit,
        ),
        cost_estimate=pl.CostEstimate(
            flops=int(flops), transcendentals=0,
            bytes_accessed=int(bytes_accessed)),
    )(*args)

    result = []
    for o, s in zip(outs, sizes):
        o = o[:nc]
        if lane_dense:
            result.append(o.reshape(n, c, s, s))
        else:
            result.append(o.reshape(n, c, s, s))
    return result


# ----------------------------------------------------------------------------
# Module wrapper
# ----------------------------------------------------------------------------
class TransferModelPallas:
    """Pallas re-implementation of Transfer_Model.forward's input pyramid."""

    def __init__(self, num_scale, size_list, stage):
        self.num_scale = num_scale
        self.size_list = tuple(size_list)
        self.stage = stage

    def forward(self, x):
        sizes = self.size_list[: self.stage + 1]
        x_in_list = multi_scale_bilinear_pallas(x, sizes)
        # TODO(synk): outputs = self.generator(x_in_list) — TransferGenerator
        # source is not provided, so the input pyramid itself is returned.
        return x_in_list


# ----------------------------------------------------------------------------
# Pure-JAX reference + self-check
# ----------------------------------------------------------------------------
def _pyramid_ref(x, sizes):
    outs = []
    for s in sizes:
        wh = jnp.asarray(_interp_matrix_np(s, x.shape[2]))
        ww = jnp.asarray(_interp_matrix_np(s, x.shape[3]))
        o = jnp.einsum("oh,nchw,pw->ncop", wh, x.astype(jnp.float32), ww,
                       precision=jax.lax.Precision.HIGHEST)
        outs.append(o.astype(x.dtype))
    return outs


if __name__ == "__main__":
    key = jax.random.PRNGKey(0)
    batch, channels, spatial = 2, 3, 16          # RGB images, NCHW
    size_list = (8, 12, 16)                      # multi-scale pyramid sizes
    stage = 2

    x = jax.random.normal(key, (batch, channels, spatial, spatial),
                          dtype=jnp.float32)

    model = TransferModelPallas(num_scale=len(size_list),
                                size_list=size_list, stage=stage)
    outs = model.forward(x)
    for o in outs:
        jax.block_until_ready(o)

    refs = _pyramid_ref(x, size_list[: stage + 1])
    ok = True
    for xidx, (o, r) in enumerate(zip(outs, refs)):
        s = size_list[xidx]
        ok = ok and (o.shape == (batch, channels, s, s))
        ok = ok and bool(jnp.allclose(o, r, atol=1e-4, rtol=1e-4))

    print("KERNEL_OK" if ok else "KERNEL_MISMATCH")
</pallas_src>

<mosaic_0001>
module attributes {stable_mosaic.version = 11 : i64} {
  func.func @kernel(%arg0: i32, %arg1: memref<8x256xf32, #tpu.memory_space<vmem>>, %arg2: memref<256x64xf32, #tpu.memory_space<vmem>>, %arg3: memref<256x144xf32, #tpu.memory_space<vmem>>, %arg4: memref<256x256xf32, #tpu.memory_space<vmem>>, %arg5: memref<8x64xf32, #tpu.memory_space<vmem>>, %arg6: memref<8x144xf32, #tpu.memory_space<vmem>>, %arg7: memref<8x256xf32, #tpu.memory_space<vmem>>) attributes {dimension_semantics = [#tpu.dimension_semantics<parallel>], iteration_bounds = array<i64: 1>, scalar_prefetch = 0 : i64, scratch_operands = 0 : i64, tpu.core_type = #tpu.core_type<tc>, window_params = [{transform_indices = @transform_0, window_bounds = array<i64: 8, 256>}, {pipeline_mode = #tpu.pipeline_mode<synchronous>, transform_indices = @transform_1, window_bounds = array<i64: 256, 64>}, {pipeline_mode = #tpu.pipeline_mode<synchronous>, transform_indices = @transform_2, window_bounds = array<i64: 256, 144>}, {pipeline_mode = #tpu.pipeline_mode<synchronous>, transform_indices = @transform_3, window_bounds = array<i64: 256, 256>}, {transform_indices = @transform_4, window_bounds = array<i64: 8, 64>}, {transform_indices = @transform_5, window_bounds = array<i64: 8, 144>}, {transform_indices = @transform_6, window_bounds = array<i64: 8, 256>}]} {
    %c0 = arith.constant 0 : index
    %c0_0 = arith.constant 0 : index
    %0 = vector.load %arg1[%c0, %c0_0] : memref<8x256xf32, #tpu.memory_space<vmem>>, vector<8x256xf32>
    %c0_1 = arith.constant 0 : index
    %c0_2 = arith.constant 0 : index
    %1 = vector.load %arg2[%c0_1, %c0_2] : memref<256x64xf32, #tpu.memory_space<vmem>>, vector<256x64xf32>
    %cst = arith.constant dense<0.000000e+00> : vector<8x64xf32>
    %2 = tpu.matmul %0, %1, %cst {dimension_numbers = #tpu.dot_dimension_numbers<[1], [0], [0], [1], [0, 0, 1, 1], [], []>} : vector<8x256xf32>, vector<256x64xf32>, vector<8x64xf32> -> vector<8x64xf32>
    %c0_3 = arith.constant 0 : index
    %c0_4 = arith.constant 0 : index
    %3 = vector.load %arg5[%c0_3, %c0_4] : memref<8x64xf32, #tpu.memory_space<vmem>>, vector<8x64xf32>
    tpu.vector_store %arg5[%c0_3, %c0_4], %2 {strides = array<i32>} : memref<8x64xf32, #tpu.memory_space<vmem>>, vector<8x64xf32>,
    %c0_5 = arith.constant 0 : index
    %c0_6 = arith.constant 0 : index
    %4 = vector.load %arg3[%c0_5, %c0_6] : memref<256x144xf32, #tpu.memory_space<vmem>>, vector<256x144xf32>
    %cst_7 = arith.constant dense<0.000000e+00> : vector<8x144xf32>
    %5 = tpu.matmul %0, %4, %cst_7 {dimension_numbers = #tpu.dot_dimension_numbers<[1], [0], [0], [1], [0, 0, 1, 1], [], []>} : vector<8x256xf32>, vector<256x144xf32>, vector<8x144xf32> -> vector<8x144xf32>
    %c0_8 = arith.constant 0 : index
    %c0_9 = arith.constant 0 : index
    %6 = vector.load %arg6[%c0_8, %c0_9] : memref<8x144xf32, #tpu.memory_space<vmem>>, vector<8x144xf32>
    tpu.vector_store %arg6[%c0_8, %c0_9], %5 {strides = array<i32>} : memref<8x144xf32, #tpu.memory_space<vmem>>, vector<8x144xf32>,
    %c0_10 = arith.constant 0 : index
    %c0_11 = arith.constant 0 : index
    %7 = vector.load %arg4[%c0_10, %c0_11] : memref<256x256xf32, #tpu.memory_space<vmem>>, vector<256x256xf32>
    %cst_12 = arith.constant dense<0.000000e+00> : vector<8x256xf32>
    %8 = tpu.matmul %0, %7, %cst_12 {dimension_numbers = #tpu.dot_dimension_numbers<[1], [0], [0], [1], [0, 0, 1, 1], [], []>} : vector<8x256xf32>, vector<256x256xf32>, vector<8x256xf32> -> vector<8x256xf32>
    %c0_13 = arith.constant 0 : index
    %c0_14 = arith.constant 0 : index
    %9 = vector.load %arg7[%c0_13, %c0_14] : memref<8x256xf32, #tpu.memory_space<vmem>>, vector<8x256xf32>
    tpu.vector_store %arg7[%c0_13, %c0_14], %8 {strides = array<i32>} : memref<8x256xf32, #tpu.memory_space<vmem>>, vector<8x256xf32>,
    return
  }
  func.func @transform_0(%arg0: i32) -> (i32, i32) {
    %c0_i32 = arith.constant 0 : i32
    %c0_i32_0 = arith.constant 0 : i32
    return %arg0, %c0_i32 : i32, i32
  }
  func.func @transform_1(%arg0: i32) -> (i32, i32) {
    %c0_i32 = arith.constant 0 : i32
    %c0_i32_0 = arith.constant 0 : i32
    %c0_i32_1 = arith.constant 0 : i32
    return %c0_i32, %c0_i32_0 : i32, i32
  }
  func.func @transform_2(%arg0: i32) -> (i32, i32) {
    %c0_i32 = arith.constant 0 : i32
    %c0_i32_0 = arith.constant 0 : i32
    %c0_i32_1 = arith.constant 0 : i32
    return %c0_i32, %c0_i32_0 : i32, i32
  }
  func.func @transform_3(%arg0: i32) -> (i32, i32) {
    %c0_i32 = arith.constant 0 : i32
    %c0_i32_0 = arith.constant 0 : i32
    %c0_i32_1 = arith.constant 0 : i32
    return %c0_i32, %c0_i32_0 : i32, i32
  }
  func.func @transform_4(%arg0: i32) -> (i32, i32) {
    %c0_i32 = arith.constant 0 : i32
    %c0_i32_0 = arith.constant 0 : i32
    return %arg0, %c0_i32 : i32, i32
  }
  func.func @transform_5(%arg0: i32) -> (i32, i32) {
    %c0_i32 = arith.constant 0 : i32
    %c0_i32_0 = arith.constant 0 : i32
    return %arg0, %c0_i32 : i32, i32
  }
  func.func @transform_6(%arg0: i32) -> (i32, i32) {
    %c0_i32 = arith.constant 0 : i32
    %c0_i32_0 = arith.constant 0 : i32
    return %arg0, %c0_i32 : i32, i32
  }
}

</mosaic_0001>

<bundles_post_ra>
// kernel: multi_scale_bilinear_pallas.1
= control target key start
LH: loop header
LB: loop body
LE: loop exit
PB: predicated region body
PF: predicated region fallthrough
CT: control target
= control target key end

     0   :  { %12 = vsyncpa [#allocation3], 0  ;;  %s1010_s0 = inlined_call_operand.hbm [shape: f32[8,256], index: 0, kind: input, shape index: {}]   ;;  %s1011_s1 = inlined_call_operand.hbm [shape: f32[256,64], index: 1, kind: input, shape index: {}]   ;;  %s1012_s2 = inlined_call_operand.hbm [shape: f32[256,144], index: 2, kind: input, shape index: {}]   ;;  %s1013_s3 = inlined_call_operand.hbm [shape: f32[256,256], index: 3, kind: input, shape index: {}]   ;;  %s1014_s4 = inlined_call_operand.hbm [shape: f32[8,64], index: 4, kind: output, shape index: {0}]   ;;  %s1015_s5 = inlined_call_operand.hbm [shape: f32[8,144], index: 5, kind: output, shape index: {1}]   ;;  %s1016_s6 = inlined_call_operand.hbm [shape: f32[8,256], index: 6, kind: output, shape index: {2}]  }
   0x1   :  { %13 = vsyncpa [#allocation6], 0 }
   0x2   :  { %14 = vsyncpa [#allocation9], 0 }
   0x3   :  { %15 = vsyncpa [#allocation4], 0 }
   0x4   :  { %16 = vsyncpa [#allocation12], 0  ;;  %s870_s21 = smov [#allocation5]   ;;  %s706_s25 = scalar_lea.hbm %s1011_s1, 4096 }
   0x5   :  { %s32_s22 = sshll.u32 %s870_s21, 4  ;;  %p707_p0 = scmp.ne.s32.totalorder %s1011_s1, %s706_s25  ;;  %s33_s22 = int_to_ptr.vmem [resolvable:$true] %s32_s22 }
   0x6   :  { %p710_p1 = scmp.lt.u32.totalorder %s706_s25, %s1011_s1 }
   0x8   :  { %p712_p2 = pnand %p710_p1, %p707_p0 }
   0xa   :  { %715 = shalt.err (!%p712_p2)
}
   0xb   :  { %s716_s30 = scalar_lea.vmem %s33_s22, 4096  ;;  %p721_p4 = scmp.lt.s32.totalorder %s33_s22, %s33_s22 }
   0xc   :  { %p717_p3 = scmp.ne.s32.totalorder %s33_s22, %s716_s30  ;;  %p722_p5 = scmp.lt.s32.totalorder %s716_s30, %s716_s30 }
   0xe   :  { %p723_p6 = por %p722_p5, %p721_p4 }
  0x10   :  { %p724_p7 = pnand %p723_p6, %p717_p3 }
  0x12   :  { %727 = shalt.err (!%p724_p7)
}
  0x13   :  { %s871_s7 = smov 128   ;;  %s872_s8 = smov 8  }
  0x14   :  { %38 = dma.hbm_to_vmem [thread:$0]  %s1011_s1, 4096, %s33_s22, [#allocation6], %s871_s7, %s871_s7, %s872_s8  }
  0x15   :  { %s873_s11 = smov [#allocation2]   ;;  %s874_s13 = smov [#allocation7]  }
  0x16   :  { %s23_s12 = sshll.u32 %s873_s11, 4  ;;  %s44_s14 = sshll.u32 %s874_s13, 4  ;;  %s24_s12 = int_to_ptr.vmem [resolvable:$true] %s23_s12  ;;  %s45_s14 = int_to_ptr.vmem [resolvable:$true] %s44_s14 }
  0x17   :  { %s728_s17 = scalar_lea.hbm %s1010_s0, 256 }
  0x18   :  { %p729_p8 = scmp.ne.s32.totalorder %s1010_s0, %s728_s17  ;;  %p732_p9 = scmp.lt.u32.totalorder %s728_s17, %s1010_s0 }
  0x1a   :  { %p734_p10 = pnand %p732_p9, %p729_p8 }
  0x1c   :  { %737 = shalt.err (!%p734_p10)
}
  0x1d   :  { %s738_s1 = scalar_lea.vmem %s24_s12, 256  ;;  %p743_p12 = scmp.lt.s32.totalorder %s24_s12, %s24_s12 }
  0x1e   :  { %p739_p11 = scmp.ne.s32.totalorder %s24_s12, %s738_s1  ;;  %p744_p13 = scmp.lt.s32.totalorder %s738_s1, %s738_s1 }
  0x20   :  { %p745_p0 = por %p744_p13, %p743_p12 }
  0x22   :  { %p746_p1 = pnand %p745_p0, %p739_p11 }
  0x24   :  { %749 = shalt.err (!%p746_p1)
}
  0x25   :  { %26 = dma.hbm_to_vmem [thread:$0]  %s1010_s0, 256, %s24_s12, [#allocation3]  }
  0x26   :  { %s750_s26 = scalar_lea.hbm %s1012_s2, 8192 }
  0x27   :  { %p751_p2 = scmp.ne.s32.totalorder %s1012_s2, %s750_s26  ;;  %p754_p3 = scmp.lt.u32.totalorder %s750_s26, %s1012_s2 }
  0x29   :  { %p756_p4 = pnand %p754_p3, %p751_p2 }
  0x2b   :  { %759 = shalt.err (!%p756_p4)
}
  0x2c   :  { %s760_s7 = scalar_lea.vmem %s45_s14, 8192  ;;  %p765_p6 = scmp.lt.s32.totalorder %s45_s14, %s45_s14 }
  0x2d   :  { %p761_p5 = scmp.ne.s32.totalorder %s45_s14, %s760_s7  ;;  %p766_p7 = scmp.lt.s32.totalorder %s760_s7, %s760_s7 }
  0x2f   :  { %p767_p8 = por %p766_p7, %p765_p6 }
  0x31   :  { %p768_p9 = pnand %p767_p8, %p761_p5 }
  0x33   :  { %771 = shalt.err (!%p768_p9)
}
  0x34   :  { %s875_s0 = smov 256   ;;  %s876_s8 = smov 16  }
  0x35   :  { %50 = dma.hbm_to_vmem [thread:$0]  %s1012_s2, 8192, %s45_s14, [#allocation6], %s875_s0, %s875_s0, %s876_s8  }
  0x36   :  { %s877_s11 = smov [#allocation8]   ;;  %s772_s16 = scalar_lea.hbm %s1013_s3, 8192 }
  0x37   :  { %s56_s12 = sshll.u32 %s877_s11, 4  ;;  %p773_p10 = scmp.ne.s32.totalorder %s1013_s3, %s772_s16  ;;  %s57_s12 = int_to_ptr.vmem [resolvable:$true] %s56_s12 }
  0x38   :  { %p776_p11 = scmp.lt.u32.totalorder %s772_s16, %s1013_s3 }
  0x3a   :  { %p778_p12 = pnand %p776_p11, %p773_p10 }
  0x3c   :  { %781 = shalt.err (!%p778_p12)
}
  0x3d   :  { %s782_s21 = scalar_lea.vmem %s57_s12, 8192  ;;  %p787_p0 = scmp.lt.s32.totalorder %s57_s12, %s57_s12 }
  0x3e   :  { %p783_p13 = scmp.ne.s32.totalorder %s57_s12, %s782_s21  ;;  %p788_p1 = scmp.lt.s32.totalorder %s782_s21, %s782_s21 }
  0x40   :  { %p789_p2 = por %p788_p1, %p787_p0 }
  0x42   :  { %p790_p3 = pnand %p789_p2, %p783_p13 }
  0x44   :  { %793 = shalt.err (!%p790_p3)
}
  0x45   :  { %62 = dma.hbm_to_vmem [thread:$0]  %s1013_s3, 8192, %s57_s12, [#allocation9], %s875_s0, %s875_s0, %s876_s8  }
  0x46   :  { %860 = dma.done.wait [#allocation3], 256  }
  0x47   :  { %861 = vsyncadd [#allocation3], 4294967040 }
  0x48   :  { %862 = dma.done.wait [#allocation6], 12288  }
  0x49   :  { %863 = vsyncadd [#allocation6], 4294955008 }
  0x4a   :  { %864 = dma.done.wait [#allocation9], 8192  }
  0x4b   :  { %865 = vsyncadd [#allocation9], 4294959104  ;;  %v93_v0 = vld [vmem:[#allocation5 + $0x80] sm:$0xff]  ;;  %v94_v1 = vld [vmem:[#allocation5 + $0x88] sm:$0xff]  ;;  %s878_s3 = smov [#allocation10]   ;;  %vm179_vm0 = vcmask 523264  }
  0x4c   :  { %v77_v2 = vld [vmem:[#allocation5] sm:$0xff]  ;;  %v535_v3 = vpack.c.bf16 %v94_v1, %v93_v0  ;;  %v78_v4 = vld [vmem:[#allocation5 + $0x8] sm:$0xff]  ;;  %v95_v5 = vld [vmem:[#allocation5 + $0x90] sm:$0xff]  ;;  %s462_s1 = sshll.u32 %s878_s3, 4  ;;  %s463_s1 = int_to_ptr.vmem [resolvable:$true] %s462_s1 }
  0x4d   :  { %v96_v6 = vld [vmem:[#allocation5 + $0x98] sm:$0xff]  ;;  %v537_v7 = vpack.c.bf16 %v78_v4, %v77_v2  ;;  %v79_v9 = vld [vmem:[#allocation5 + $0x10] sm:$0xff]  ;;  %v97_v11 = vld [vmem:[#allocation5 + $0xa0] sm:$0xff]  ;;  %s794_s22 = scalar_lea.vmem %s463_s1, 128  ;;  %p799_p5 = scmp.lt.s32.totalorder %s463_s1, %s463_s1 }
  0x4e   :  { %v539_v8 = vpack.c.bf16 %v96_v6, %v95_v5  ;;  %v80_v10 = vld [vmem:[#allocation5 + $0x18] sm:$0xff]  ;;  %536 = vmatprep.subr.bf16.mxu0 %v535_v3  ;;  %v98_v12 = vld [vmem:[#allocation5 + $0xa8] sm:$0xff]  ;;  %v81_v15 = vld [vmem:[#allocation5 + $0x20] sm:$0xff]  ;;  %p795_p4 = scmp.ne.s32.totalorder %s463_s1, %s794_s22  ;;  %p800_p6 = scmp.lt.s32.totalorder %s794_s22, %s794_s22 }
  0x4f   :  { %538 = vmatpush3.bf16.msra.mxu0 %v537_v7  ;;  %v541_v13 = vpack.c.bf16 %v80_v10, %v79_v9  ;;  %v543_v14 = vpack.c.bf16 %v98_v12, %v97_v11  ;;  %v82_v16 = vld [vmem:[#allocation5 + $0x28] sm:$0xff]  ;;  %v99_v17 = vld [vmem:[#allocation5 + $0xb0] sm:$0xff]  ;;  %v100_v18 = vld [vmem:[#allocation5 + $0xb8] sm:$0xff] }
  0x50   :  { %540 = vmatprep.subr.bf16.mxu0 %v539_v8  ;;  %v545_v19 = vpack.c.bf16 %v82_v16, %v81_v15  ;;  %v547_v20 = vpack.c.bf16 %v100_v18, %v99_v17  ;;  %v83_v21 = vld [vmem:[#allocation5 + $0x30] sm:$0xff]  ;;  %v84_v22 = vld [vmem:[#allocation5 + $0x38] sm:$0xff]  ;;  %v101_v23 = vld [vmem:[#allocation5 + $0xc0] sm:$0xff]  ;;  %p801_p7 = por %p800_p6, %p799_p5 }
  0x51   :  { %v102_v24 = vld [vmem:[#allocation5 + $0xc8] sm:$0xff]  ;;  %v184_v26 = vld [vmem:[#allocation7 + $0x18] sm:$0xff]  ;;  %v181_v28 = vld [vmem:[#allocation7] sm:$0xff]  ;;  %v549_v29 = vpack.c.bf16 %v84_v22, %v83_v21 }
  0x52   :  { %v182_v25 = vld [vmem:[#allocation7 + $0x8] sm:$0xff]  ;;  %v964_v27 = vld [vmem:[#allocation2 + $0x8] sm:$0xff]  ;;  %v85_v30 = vld [vmem:[#allocation5 + $0x40] sm:$0xff]  ;;  %v551_v33 = vpack.c.bf16 %v102_v24, %v101_v23  ;;  %p802_p8 = pnand %p801_p7, %p795_p4 }
  0x53   :  { %542 = vmatpush3.bf16.msra.mxu0 %v541_v13  ;;  %v567_v31 = vpack.c.bf16 %v184_v26, %v182_v25  ;;  %173 = vmatprep.mubr.f32.mxu0 %v964_v27  ;;  %v183_v32 = vld [vmem:[#allocation7 + $0x10] sm:$0xff]  ;;  %v86_v34 = vld [vmem:[#allocation5 + $0x48] sm:$0xff]  ;;  %v104_v36 = vld [vmem:[#allocation5 + $0xd8] sm:$0xff] }
  0x54   :  { %544 = vmatprep.subr.bf16.mxu0 %v543_v14  ;;  %v103_v35 = vld [vmem:[#allocation5 + $0xd0] sm:$0xff]  ;;  %v569_v37 = vpack.c.bf16 %v183_v32, %v181_v28  ;;  %309 = vmatprep.mubr.f32.mxu1 %v964_v27  ;;  %v186_v38 = vld [vmem:[#allocation7 + $0x28] sm:$0xff]  ;;  %v188_v39 = vld [vmem:[#allocation7 + $0x38] sm:$0xff]  ;;  %v553_v43 = vpack.c.bf16 %v86_v34, %v85_v30 }
  0x55   :  { %568 = vmatprep.subr.bf16.mxu1 %v567_v31  ;;  %v185_v40 = vld [vmem:[#allocation7 + $0x20] sm:$0xff]  ;;  %v571_v41 = vpack.c.bf16 %v188_v39, %v186_v38  ;;  %v187_v42 = vld [vmem:[#allocation7 + $0x30] sm:$0xff]  ;;  %v88_v45 = vld [vmem:[#allocation5 + $0x58] sm:$0xff]  ;;  %v555_v48 = vpack.c.bf16 %v104_v36, %v103_v35 }
  0x56   :  { %570 = vmatpush1.bf16.msra.mxu1 %v569_v37  ;;  %v87_v44 = vld [vmem:[#allocation5 + $0x50] sm:$0xff]  ;;  %v573_v46 = vpack.c.bf16 %v187_v42, %v185_v40  ;;  %v190_v47 = vld [vmem:[#allocation7 + $0x48] sm:$0xff]  ;;  %v192_v49 = vld [vmem:[#allocation7 + $0x58] sm:$0xff] }
  0x57   :  { %546 = vmatpush3.bf16.msra.mxu0 %v545_v19  ;;  %572 = vmatprep.subr.bf16.mxu1 %v571_v41  ;;  %v189_v50 = vld [vmem:[#allocation7 + $0x40] sm:$0xff]  ;;  %v191_v51 = vld [vmem:[#allocation7 + $0x50] sm:$0xff]  ;;  %v106_v53 = vld [vmem:[#allocation5 + $0xe8] sm:$0xff]  ;;  %v575_v54 = vpack.c.bf16 %v192_v49, %v190_v47  ;;  %v557_v58 = vpack.c.bf16 %v88_v45, %v87_v44 }
  0x58   :  { %548 = vmatprep.subr.bf16.mxu0 %v547_v20  ;;  %v105_v52 = vld [vmem:[#allocation5 + $0xe0] sm:$0xff]  ;;  %v577_v55 = vpack.c.bf16 %v191_v51, %v189_v50  ;;  %v194_v56 = vld [vmem:[#allocation7 + $0x68] sm:$0xff]  ;;  %v196_v57 = vld [vmem:[#allocation7 + $0x78] sm:$0xff] }
  0x59   :  { %v579_v59 = vpack.c.bf16 %v196_v57, %v194_v56  ;;  %v193_v60 = vld [vmem:[#allocation7 + $0x60] sm:$0xff]  ;;  %v195_v61 = vld [vmem:[#allocation7 + $0x70] sm:$0xff]  ;;  %v559_v62 = vpack.c.bf16 %v106_v53, %v105_v52  ;;  %v90_v0 = vld [vmem:[#allocation5 + $0x68] sm:$0xff] }
  0x5a   :  { %574 = vmatpush1.bf16.msra.mxu1 %v573_v46  ;;  %v89_v63 = vld [vmem:[#allocation5 + $0x60] sm:$0xff]  ;;  %v107_v1 = vld [vmem:[#allocation5 + $0xf0] sm:$0xff]  ;;  %v108_v2 = vld [vmem:[#allocation5 + $0xf8] sm:$0xff]  ;;  %v581_v5 = vpack.c.bf16 %v195_v61, %v193_v60 }
  0x5b   :  { %550 = vmatpush3.bf16.msra.mxu0 %v549_v29  ;;  %576 = vmatprep.subr.bf16.mxu1 %v575_v54  ;;  %v198_v3 = vld [vmem:[#allocation7 + $0x88] sm:$0xff]  ;;  %v200_v4 = vld [vmem:[#allocation7 + $0x98] sm:$0xff]  ;;  %v561_v6 = vpack.c.bf16 %v90_v0, %v89_v63  ;;  %v91_v7 = vld [vmem:[#allocation5 + $0x70] sm:$0xff]  ;;  %v563_v11 = vpack.c.bf16 %v108_v2, %v107_v1 }
  0x5c   :  { %552 = vmatprep.subr.bf16.mxu0 %v551_v33  ;;  %v583_v8 = vpack.c.bf16 %v200_v4, %v198_v3  ;;  %v197_v9 = vld [vmem:[#allocation7 + $0x80] sm:$0xff]  ;;  %v199_v10 = vld [vmem:[#allocation7 + $0x90] sm:$0xff]  ;;  %v92_v12 = vld [vmem:[#allocation5 + $0x78] sm:$0xff] }
  0x5d   :  { %v202_v13 = vld [vmem:[#allocation7 + $0xa8] sm:$0xff]  ;;  %v204_v14 = vld [vmem:[#allocation7 + $0xb8] sm:$0xff]  ;;  %v585_v17 = vpack.c.bf16 %v199_v10, %v197_v9  ;;  %v565_v18 = vpack.c.bf16 %v92_v12, %v91_v7  ;;  %v319_v19 = vld [vmem:[#allocation8] sm:$0xff] }
  0x5e   :  { %578 = vmatpush1.bf16.msra.mxu1 %v577_v55  ;;  %v320_v15 = vld [vmem:[#allocation8 + $0x8] sm:$0xff]  ;;  %v322_v16 = vld [vmem:[#allocation8 + $0x18] sm:$0xff]  ;;  %v587_v20 = vpack.c.bf16 %v204_v14, %v202_v13  ;;  %v201_v21 = vld [vmem:[#allocation7 + $0xa0] sm:$0xff] }
  0x5f   :  { %554 = vmatpush3.bf16.msra.mxu0 %v553_v43  ;;  %580 = vmatprep.subr.bf16.mxu1 %v579_v59  ;;  %v203_v22 = vld [vmem:[#allocation7 + $0xb0] sm:$0xff]  ;;  %v631_v23 = vpack.c.bf16 %v322_v16, %v320_v15  ;;  %v206_v25 = vld [vmem:[#allocation7 + $0xc8] sm:$0xff]  ;;  %v208_v26 = vld [vmem:[#allocation7 + $0xd8] sm:$0xff] }
  0x60   :  { %556 = vmatprep.subr.bf16.mxu0 %v555_v48  ;;  %v321_v24 = vld [vmem:[#allocation8 + $0x10] sm:$0xff]  ;;  %v324_v28 = vld [vmem:[#allocation8 + $0x28] sm:$0xff]  ;;  %v326_v29 = vld [vmem:[#allocation8 + $0x38] sm:$0xff]  ;;  %v589_v31 = vpack.c.bf16 %v203_v22, %v201_v21  ;;  %v591_v34 = vpack.c.bf16 %v208_v26, %v206_v25 }
  0x61   :  { %v968_v30 = vld [vmem:[#allocation2] sm:$0xff]  ;;  %v633_v32 = vpack.c.bf16 %v321_v24, %v319_v19  ;;  %v323_v33 = vld [vmem:[#allocation8 + $0x20] sm:$0xff]  ;;  %v635_v37 = vpack.c.bf16 %v326_v29, %v324_v28  ;;  %v210_v39 = vld [vmem:[#allocation7 + $0xe8] sm:$0xff] }
  0x62   :  { %582 = vmatpush1.bf16.msra.mxu1 %v581_v5  ;;  %v205_v35 = vld [vmem:[#allocation7 + $0xc0] sm:$0xff]  ;;  %v207_v36 = vld [vmem:[#allocation7 + $0xd0] sm:$0xff]  ;;  %v212_v40 = vld [vmem:[#allocation7 + $0xf8] sm:$0xff] }
  0x63   :  { %558 = vmatpush3.bf16.msra.mxu0 %v557_v58  ;;  %584 = vmatprep.subr.bf16.mxu1 %v583_v8  ;;  %v325_v38 = vld [vmem:[#allocation8 + $0x30] sm:$0xff]  ;;  %v328_v41 = vld [vmem:[#allocation8 + $0x48] sm:$0xff]  ;;  %v330_v42 = vld [vmem:[#allocation8 + $0x58] sm:$0xff]  ;;  %v593_v43 = vpack.c.bf16 %v207_v36, %v205_v35  ;;  %v595_v46 = vpack.c.bf16 %v212_v40, %v210_v39 }
  0x64   :  { %560 = vmatprep.subr.bf16.mxu0 %v559_v62  ;;  %v637_v44 = vpack.c.bf16 %v325_v38, %v323_v33  ;;  %v327_v45 = vld [vmem:[#allocation8 + $0x40] sm:$0xff]  ;;  %v211_v48 = vld [vmem:[#allocation7 + $0xf0] sm:$0xff]  ;;  %v639_v49 = vpack.c.bf16 %v330_v42, %v328_v41  ;;  %v214_v51 = vld [vmem:[#allocation7 + $0x108] sm:$0xff] }
  0x65   :  { %v209_v47 = vld [vmem:[#allocation7 + $0xe0] sm:$0xff]  ;;  %v329_v50 = vld [vmem:[#allocation8 + $0x50] sm:$0xff]  ;;  %v216_v52 = vld [vmem:[#allocation7 + $0x118] sm:$0xff] }
  0x66   :  { %586 = vmatpush1.bf16.msra.mxu1 %v585_v17  ;;  %v332_v53 = vld [vmem:[#allocation8 + $0x68] sm:$0xff]  ;;  %v334_v54 = vld [vmem:[#allocation8 + $0x78] sm:$0xff]  ;;  %v597_v55 = vpack.c.bf16 %v211_v48, %v209_v47  ;;  %v641_v56 = vpack.c.bf16 %v329_v50, %v327_v45  ;;  %v331_v57 = vld [vmem:[#allocation8 + $0x60] sm:$0xff]  ;;  %v599_v58 = vpack.c.bf16 %v216_v52, %v214_v51 }
  0x67   :  { %562 = vmatpush3.bf16.msra.mxu0 %v561_v6  ;;  %588 = vmatprep.subr.bf16.mxu1 %v587_v20  ;;  %v213_v59 = vld [vmem:[#allocation7 + $0x100] sm:$0xff]  ;;  %v215_v60 = vld [vmem:[#allocation7 + $0x110] sm:$0xff]  ;;  %v643_v61 = vpack.c.bf16 %v334_v54, %v332_v53  ;;  %v218_v63 = vld [vmem:[#allocation7 + $0x128] sm:$0xff] }
  0x68   :  { %564 = vmatprep.subr.bf16.mxu0 %v563_v11  ;;  %v333_v62 = vld [vmem:[#allocation8 + $0x70] sm:$0xff]  ;;  %v220_v0 = vld [vmem:[#allocation7 + $0x138] sm:$0xff]  ;;  %v336_v1 = vld [vmem:[#allocation8 + $0x88] sm:$0xff] }
  0x69   :  { %v338_v2 = vld [vmem:[#allocation8 + $0x98] sm:$0xff]  ;;  %v645_v3 = vpack.c.bf16 %v333_v62, %v331_v57  ;;  %v335_v4 = vld [vmem:[#allocation8 + $0x80] sm:$0xff]  ;;  %v603_v5 = vpack.c.bf16 %v220_v0, %v218_v63  ;;  %v219_v7 = vld [vmem:[#allocation7 + $0x130] sm:$0xff] }
  0x6a   :  { %590 = vmatpush1.bf16.msra.mxu1 %v589_v31  ;;  %v217_v6 = vld [vmem:[#allocation7 + $0x120] sm:$0xff]  ;;  %v647_v8 = vpack.c.bf16 %v338_v2, %v336_v1  ;;  %v337_v9 = vld [vmem:[#allocation8 + $0x90] sm:$0xff]  ;;  %v222_v10 = vld [vmem:[#allocation7 + $0x148] sm:$0xff] }
  0x6b   :  { %566 = vmatpush3.bf16.msra.mxu0 %v565_v18  ;;  %592 = vmatprep.subr.bf16.mxu1 %v591_v34  ;;  %v224_v11 = vld [vmem:[#allocation7 + $0x158] sm:$0xff]  ;;  %v340_v12 = vld [vmem:[#allocation8 + $0xa8] sm:$0xff]  ;;  %v605_v14 = vpack.c.bf16 %v219_v7, %v217_v6  ;;  %v649_v15 = vpack.c.bf16 %v337_v9, %v335_v4  ;;  %v339_v16 = vld [vmem:[#allocation8 + $0xa0] sm:$0xff] }
  0x6c   :  { %632 = vmatprep.subr.bf16.mxu0 %v631_v23  ;;  %v342_v13 = vld [vmem:[#allocation8 + $0xb8] sm:$0xff]  ;;  %v607_v17 = vpack.c.bf16 %v224_v11, %v222_v10  ;;  %v221_v18 = vld [vmem:[#allocation7 + $0x140] sm:$0xff]  ;;  %v223_v19 = vld [vmem:[#allocation7 + $0x150] sm:$0xff] }
  0x6d   :  { %v651_v20 = vpack.c.bf16 %v342_v13, %v340_v12  ;;  %v341_v21 = vld [vmem:[#allocation8 + $0xb0] sm:$0xff]  ;;  %v226_v22 = vld [vmem:[#allocation7 + $0x168] sm:$0xff]  ;;  %v228_v23 = vld [vmem:[#allocation7 + $0x178] sm:$0xff]  ;;  %v609_v26 = vpack.c.bf16 %v223_v19, %v221_v18 }
  0x6e   :  { %174 = vmatmul.mubr.f32.vlgmr.msra.gmra.mrb[0].mxu0 %v968_v30  ;;  %594 = vmatpush1.bf16.msra.mxu1 %v593_v43  ;;  %v344_v24 = vld [vmem:[#allocation8 + $0xc8] sm:$0xff]  ;;  %v346_v25 = vld [vmem:[#allocation8 + $0xd8] sm:$0xff]  ;;  %v653_v28 = vpack.c.bf16 %v341_v21, %v339_v16  ;;  %v343_v29 = vld [vmem:[#allocation8 + $0xc0] sm:$0xff]  ;;  %v611_v31 = vpack.c.bf16 %v228_v23, %v226_v22 }
  0x6f   :  { %634 = vmatpush1.bf16.msra.mxu0 %v633_v32  ;;  %447 = vmatprep.mubr.f32.mxu0 %v964_v27  ;;  %v601_v27 = vpack.c.bf16 %v215_v60, %v213_v59  ;;  %v225_v32 = vld [vmem:[#allocation7 + $0x160] sm:$0xff]  ;;  %v227_v33 = vld [vmem:[#allocation7 + $0x170] sm:$0xff]  ;;  %v655_v34 = vpack.c.bf16 %v346_v25, %v344_v24  ;;  %v230_v36 = vld [vmem:[#allocation7 + $0x188] sm:$0xff] }
  0x70   :  { %636 = vmatprep.subr.bf16.mxu0 %v635_v37  ;;  %596 = vmatprep.subr.bf16.mxu1 %v595_v46  ;;  %v345_v35 = vld [vmem:[#allocation8 + $0xd0] sm:$0xff]  ;;  %v232_v37 = vld [vmem:[#allocation7 + $0x198] sm:$0xff]  ;;  %v348_v38 = vld [vmem:[#allocation8 + $0xe8] sm:$0xff]  ;;  %v613_v40 = vpack.c.bf16 %v227_v33, %v225_v32 }
  0x71   :  { %v350_v39 = vld [vmem:[#allocation8 + $0xf8] sm:$0xff]  ;;  %v657_v41 = vpack.c.bf16 %v345_v35, %v343_v29  ;;  %v347_v42 = vld [vmem:[#allocation8 + $0xe0] sm:$0xff]  ;;  %v615_v43 = vpack.c.bf16 %v232_v37, %v230_v36  ;;  %v231_v45 = vld [vmem:[#allocation7 + $0x190] sm:$0xff] }
  0x72   :  { %598 = vmatpush1.bf16.msra.mxu1 %v597_v55  ;;  %v659_v46 = vpack.c.bf16 %v350_v39, %v348_v38  ;;  %v349_v47 = vld [vmem:[#allocation8 + $0xf0] sm:$0xff]  ;;  %v234_v48 = vld [vmem:[#allocation7 + $0x1a8] sm:$0xff]  ;;  %v354_v51 = vld [vmem:[#allocation8 + $0x118] sm:$0xff] }
  0x73   :  { %638 = vmatpush1.bf16.msra.mxu0 %v637_v44  ;;  %600 = vmatprep.subr.bf16.mxu1 %v599_v58  ;;  %v229_v44 = vld [vmem:[#allocation7 + $0x180] sm:$0xff]  ;;  %v352_v50 = vld [vmem:[#allocation8 + $0x108] sm:$0xff]  ;;  %v661_v53 = vpack.c.bf16 %v349_v47, %v347_v42  ;;  %v235_v57 = vld [vmem:[#allocation7 + $0x1b0] sm:$0xff] }
  0x74   :  { %640 = vmatprep.subr.bf16.mxu0 %v639_v49  ;;  %v236_v49 = vld [vmem:[#allocation7 + $0x1b8] sm:$0xff]  ;;  %v617_v52 = vpack.c.bf16 %v231_v45, %v229_v44  ;;  %v351_v54 = vld [vmem:[#allocation8 + $0x100] sm:$0xff]  ;;  %v663_v58 = vpack.c.bf16 %v354_v51, %v352_v50  ;;  %v353_v59 = vld [vmem:[#allocation8 + $0x110] sm:$0xff] }
  0x75   :  { %v619_v55 = vpack.c.bf16 %v236_v49, %v234_v48  ;;  %v238_v60 = vld [vmem:[#allocation7 + $0x1c8] sm:$0xff]  ;;  %v358_v63 = vld [vmem:[#allocation8 + $0x138] sm:$0xff]  ;;  %v665_v1 = vpack.c.bf16 %v353_v59, %v351_v54  ;;  %v355_v2 = vld [vmem:[#allocation8 + $0x120] sm:$0xff] }
  0x76   :  { %602 = vmatpush1.bf16.msra.mxu1 %v601_v27  ;;  %v356_v62 = vld [vmem:[#allocation8 + $0x128] sm:$0xff]  ;;  %v239_v4 = vld [vmem:[#allocation7 + $0x1d0] sm:$0xff]  ;;  %v362_v10 = vld [vmem:[#allocation8 + $0x158] sm:$0xff] }
  0x77   :  { %642 = vmatpush1.bf16.msra.mxu0 %v641_v56  ;;  %604 = vmatprep.subr.bf16.mxu1 %v603_v5  ;;  %v233_v56 = vld [vmem:[#allocation7 + $0x1a0] sm:$0xff]  ;;  %v667_v5 = vpack.c.bf16 %v358_v63, %v356_v62  ;;  %v357_v6 = vld [vmem:[#allocation8 + $0x130] sm:$0xff]  ;;  %v242_v7 = vld [vmem:[#allocation7 + $0x1e8] sm:$0xff] }
  0x78   :  { %644 = vmatprep.subr.bf16.mxu0 %v643_v61  ;;  %v240_v61 = vld [vmem:[#allocation7 + $0x1d8] sm:$0xff]  ;;  %v621_v0 = vpack.c.bf16 %v235_v57, %v233_v56  ;;  %v360_v9 = vld [vmem:[#allocation8 + $0x148] sm:$0xff]  ;;  %v669_v12 = vpack.c.bf16 %v357_v6, %v355_v2  ;;  %v361_v18 = vld [vmem:[#allocation8 + $0x150] sm:$0xff] }
  0x79   :  { %v623_v27 = vpack.c.bf16 %v240_v61, %v238_v60  ;;  %v671_v16 = vpack.c.bf16 %v362_v10, %v360_v9  ;;  %v364_v19 = vld [vmem:[#allocation8 + $0x168] sm:$0xff]  ;;  %v363_v24 = vld [vmem:[#allocation8 + $0x160] sm:$0xff]  ;;  %v365_v25 = vld [vmem:[#allocation8 + $0x170] sm:$0xff] }
  0x7a   :  { %606 = vmatpush1.bf16.msra.mxu1 %v605_v14  ;;  %v241_v14 = vld [vmem:[#allocation7 + $0x1e0] sm:$0xff]  ;;  %v677_v29 = vpack.c.bf16 %v365_v25, %v363_v24  ;;  %v369_v33 = vld [vmem:[#allocation8 + $0x190] sm:$0xff]  ;;  %v374_v35 = vld [vmem:[#allocation8 + $0x1b8] sm:$0xff] }
  0x7b   :  { %646 = vmatpush1.bf16.msra.mxu0 %v645_v3  ;;  %608 = vmatprep.subr.bf16.mxu1 %v607_v17  ;;  %v237_v3 = vld [vmem:[#allocation7 + $0x1c0] sm:$0xff]  ;;  %v373_v39 = vld [vmem:[#allocation8 + $0x1b0] sm:$0xff]  ;;  %v382_v47 = vld [vmem:[#allocation8 + $0x1f8] sm:$0xff] }
  0x7c   :  { %648 = vmatprep.subr.bf16.mxu0 %v647_v8  ;;  %v244_v8 = vld [vmem:[#allocation7 + $0x1f8] sm:$0xff]  ;;  %v625_v11 = vpack.c.bf16 %v239_v4, %v237_v3  ;;  %v359_v17 = vld [vmem:[#allocation8 + $0x140] sm:$0xff]  ;;  %v377_v45 = vld [vmem:[#allocation8 + $0x1d0] sm:$0xff] }
  0x7d   :  { %v627_v13 = vpack.c.bf16 %v244_v8, %v242_v7  ;;  %v673_v22 = vpack.c.bf16 %v361_v18, %v359_v17  ;;  %v367_v32 = vld [vmem:[#allocation8 + $0x180] sm:$0xff]  ;;  %v381_v51 = vld [vmem:[#allocation8 + $0x1f0] sm:$0xff] }
  0x7e   :  { %610 = vmatpush1.bf16.msra.mxu1 %v609_v26  ;;  %v368_v26 = vld [vmem:[#allocation8 + $0x188] sm:$0xff]  ;;  %v681_v36 = vpack.c.bf16 %v369_v33, %v367_v32  ;;  %v371_v38 = vld [vmem:[#allocation8 + $0x1a0] sm:$0xff] }
  0x7f   :  { %650 = vmatpush1.bf16.msra.mxu0 %v649_v15  ;;  %612 = vmatprep.subr.bf16.mxu1 %v611_v31  ;;  %v243_v15 = vld [vmem:[#allocation7 + $0x1f0] sm:$0xff]  ;;  %v685_v42 = vpack.c.bf16 %v373_v39, %v371_v38  ;;  %v375_v44 = vld [vmem:[#allocation8 + $0x1c0] sm:$0xff] }
  0x80   :  { %652 = vmatprep.subr.bf16.mxu0 %v651_v20  ;;  %v366_v20 = vld [vmem:[#allocation8 + $0x178] sm:$0xff]  ;;  %v629_v21 = vpack.c.bf16 %v243_v15, %v241_v14  ;;  %v689_v48 = vpack.c.bf16 %v377_v45, %v375_v44  ;;  %v379_v50 = vld [vmem:[#allocation8 + $0x1e0] sm:$0xff] }
  0x81   :  { %v675_v23 = vpack.c.bf16 %v366_v20, %v364_v19 }
  0x82   :  { %614 = vmatpush1.bf16.msra.mxu1 %v613_v40  ;;  %v376_v40 = vld [vmem:[#allocation8 + $0x1c8] sm:$0xff] }
  0x83   :  { %654 = vmatpush1.bf16.msra.mxu0 %v653_v28  ;;  %616 = vmatprep.subr.bf16.mxu1 %v615_v43  ;;  %v370_v28 = vld [vmem:[#allocation8 + $0x198] sm:$0xff] }
  0x84   :  { %656 = vmatprep.subr.bf16.mxu0 %v655_v34  ;;  %v679_v31 = vpack.c.bf16 %v370_v28, %v368_v26  ;;  %v372_v34 = vld [vmem:[#allocation8 + $0x1a8] sm:$0xff] }
  0x85   :  { %v683_v37 = vpack.c.bf16 %v374_v35, %v372_v34 }
  0x86   :  { %618 = vmatpush1.bf16.msra.mxu1 %v617_v52  ;;  %v693_v52 = vpack.c.bf16 %v381_v51, %v379_v50 }
  0x87   :  { %658 = vmatpush1.bf16.msra.mxu0 %v657_v41  ;;  %620 = vmatprep.subr.bf16.mxu1 %v619_v55  ;;  %v378_v41 = vld [vmem:[#allocation8 + $0x1d8] sm:$0xff] }
  0x88   :  { %660 = vmatprep.subr.bf16.mxu0 %v659_v46  ;;  %v687_v43 = vpack.c.bf16 %v378_v41, %v376_v40  ;;  %v380_v46 = vld [vmem:[#allocation8 + $0x1e8] sm:$0xff] }
  0x89   :  { %v691_v49 = vpack.c.bf16 %v382_v47, %v380_v46 }
  0x8a   :  { %622 = vmatpush1.bf16.msra.mxu1 %v621_v0 }
  0x8b   :  { %662 = vmatpush1.bf16.msra.mxu0 %v661_v53  ;;  %624 = vmatprep.subr.bf16.mxu1 %v623_v27 }
  0x8c   :  { %664 = vmatprep.subr.bf16.mxu0 %v663_v58 }
  0x8e   :  { %626 = vmatpush1.bf16.msra.mxu1 %v625_v11 }
  0x8f   :  { %666 = vmatpush1.bf16.msra.mxu0 %v665_v1  ;;  %628 = vmatprep.subr.bf16.mxu1 %v627_v13 }
  0x90   :  { %668 = vmatprep.subr.bf16.mxu0 %v667_v5 }
  0x92   :  { %630 = vmatpush1.bf16.msra.mxu1 %v629_v21 }
  0x93   :  { %670 = vmatpush1.bf16.msra.mxu0 %v669_v12 }
  0x94   :  { %672 = vmatprep.subr.bf16.mxu0 %v671_v16 }
  0x95   :  { %310 = vmatmul.mubr.f32.vlgmr.msra.gmra.mrb[0].mxu1 %v968_v30 }
  0x97   :  { %674 = vmatpush1.bf16.msra.mxu0 %v673_v22 }
  0x98   :  { %676 = vmatprep.subr.bf16.mxu0 %v675_v23 }
  0x9b   :  { %678 = vmatpush1.bf16.msra.mxu0 %v677_v29 }
  0x9c   :  { %680 = vmatprep.subr.bf16.mxu0 %v679_v31 }
  0x9f   :  { %682 = vmatpush1.bf16.msra.mxu0 %v681_v36 }
  0xa0   :  { %684 = vmatprep.subr.bf16.mxu0 %v683_v37 }
  0xa3   :  { %686 = vmatpush1.bf16.msra.mxu0 %v685_v42 }
  0xa4   :  { %688 = vmatprep.subr.bf16.mxu0 %v687_v43 }
  0xa7   :  { %690 = vmatpush1.bf16.msra.mxu0 %v689_v48 }
  0xa8   :  { %692 = vmatprep.subr.bf16.mxu0 %v691_v49 }
  0xab   :  { %694 = vmatpush1.bf16.msra.mxu0 %v693_v52 }
  0xae   :  { %448 = vmatmul.mubr.f32.vlgmr.msra.gmra.mrb[2].mxu0 %v968_v30 }
 0x141   :  { %v532_v53 = vpop.f32.mrb[0].mxu0 }
 0x142   :  { %v533_v54 = vpop.f32.mrb[1].mxu0 }
 0x143   :  { %v534_v55 = vadd.f32 %v533_v54, %v532_v53 }
 0x145   :  { %180 = vst.msk [vmem:[#allocation10] sm:$0xff] %vm179_vm0, %v534_v55 }
 0x146   :  { %805 = shalt.err (!%p802_p8)
}
 0x147   :  { %s806_s25 = scalar_lea.hbm %s1014_s4, 128 }
 0x148   :  { %p807_p9 = scmp.ne.s32.totalorder %s1014_s4, %s806_s25  ;;  %p810_p10 = scmp.lt.u32.totalorder %s806_s25, %s1014_s4 }
 0x14a   :  { %p812_p11 = pnand %p810_p10, %p807_p9 }
 0x14c   :  { %815 = shalt.err (!%p812_p11)
}
 0x14d   :  { %465 = dma.vmem_to_hbm [thread:$0]  %s463_s1, 128, %s1014_s4, [#allocation4]   ;;  %vm317_vm1 = vcmask 130048  }
 0x14e   :  { %s879_s0 = smov [#allocation11]  }
 0x14f   :  { %s472_s8 = sshll.u32 %s879_s0, 4  ;;  %s473_s8 = int_to_ptr.vmem [resolvable:$true] %s472_s8 }
 0x150   :  { %s816_s9 = scalar_lea.vmem %s473_s8, 256  ;;  %p821_p13 = scmp.lt.s32.totalorder %s473_s8, %s473_s8 }
 0x151   :  { %p817_p12 = scmp.ne.s32.totalorder %s473_s8, %s816_s9  ;;  %p822_p0 = scmp.lt.s32.totalorder %s816_s9, %s816_s9 }
 0x153   :  { %p823_p1 = por %p822_p0, %p821_p13 }
 0x155   :  { %p824_p2 = pnand %p823_p1, %p817_p12 }
 0x168   :  { %v311_v30 = vpop.f32.mrb[0].mxu1 }
 0x169   :  { %316 = vst [vmem:[#allocation11] sm:$0xff] %v311_v30  ;;  %v313_v56 = vpop.f32.mrb[1].mxu1 }
 0x16a   :  { %318 = vst.msk [vmem:[#allocation11 + $0x8] sm:$0xff] %vm317_vm1, %v313_v56 }
 0x16b   :  { %827 = shalt.err (!%p824_p2)
}
 0x16c   :  { %s828_s12 = scalar_lea.hbm %s1015_s5, 256 }
 0x16d   :  { %p829_p3 = scmp.ne.s32.totalorder %s1015_s5, %s828_s12  ;;  %p832_p4 = scmp.lt.u32.totalorder %s828_s12, %s1015_s5 }
 0x16f   :  { %p834_p5 = pnand %p832_p4, %p829_p3 }
 0x171   :  { %837 = shalt.err (!%p834_p5)
}
 0x172   :  { %475 = dma.vmem_to_hbm [thread:$0]  %s473_s8, 256, %s1015_s5, [#allocation12]  }
 0x173   :  { %s880_s19 = smov [#allocation13]  }
 0x174   :  { %s482_s20 = sshll.u32 %s880_s19, 4  ;;  %s483_s20 = int_to_ptr.vmem [resolvable:$true] %s482_s20 }
 0x175   :  { %s838_s21 = scalar_lea.vmem %s483_s20, 256  ;;  %p843_p7 = scmp.lt.s32.totalorder %s483_s20, %s483_s20 }
 0x176   :  { %p839_p6 = scmp.ne.s32.totalorder %s483_s20, %s838_s21  ;;  %p844_p8 = scmp.lt.s32.totalorder %s838_s21, %s838_s21 }
 0x178   :  { %p845_p9 = por %p844_p8, %p843_p7 }
 0x17a   :  { %p846_p10 = pnand %p845_p9, %p839_p6 }
 0x181   :  { %v449_v57 = vpop.f32.mrb[2].mxu0 }
 0x182   :  { %454 = vst [vmem:[#allocation13] sm:$0xff] %v449_v57  ;;  %v451_v58 = vpop.f32.mrb[3].mxu0 }
 0x183   :  { %455 = vst [vmem:[#allocation13 + $0x8] sm:$0xff] %v451_v58 }
 0x184   :  { %849 = shalt.err (!%p846_p10)
}
 0x185   :  { %s850_s3 = scalar_lea.hbm %s1016_s6, 256 }
 0x186   :  { %p851_p11 = scmp.ne.s32.totalorder %s1016_s6, %s850_s3  ;;  %p854_p12 = scmp.lt.u32.totalorder %s850_s3, %s1016_s6 }
 0x188   :  { %p856_p13 = pnand %p854_p12, %p851_p11 }
 0x18a   :  { %859 = shalt.err (!%p856_p13)
}
 0x18b   :  { %485 = dma.vmem_to_hbm [thread:$0]  %s483_s20, 256, %s1016_s6, [#allocation12]  }
 0x18c   :  { %866 = dma.done.wait [#allocation4], 128  }
 0x18d   :  { %867 = vsyncadd [#allocation4], 4294967168 }
 0x18e   :  { %868 = dma.done.wait [#allocation12], 512  }
 0x18f   :  { %869 = vsyncadd [#allocation12], 4294966784 }
 0x190   :  { %495 = vsyncpa [#allocation3], 1 }
 0x191   :  { %496 = vsyncpa [#allocation6], 1 }
 0x192   :  { %497 = vsyncpa [#allocation9], 1 }
 0x193   :  { %498 = vsyncpa [#allocation4], 1 }
 0x194   :  { %499 = vsyncpa [#allocation12], 1 }

</bundles_post_ra>
